<compile_context>
chip_gen: v7x
topology: tpu7x:2x2x1
jax: 0.10.0
libtpu: 0.0.40
codegen_flags: <defaults>
</compile_context>

<pallas_src>
import jax
import jax.numpy as jnp
from jax.experimental import pallas as pl
from jax.experimental.pallas import tpu as pltpu


def _pooler_kernel(x_ref, w_ref, b_ref, o_ref):
    # x_ref: (TB, H_in)    [CLS] rows for this batch tile (caller dtype)
    # w_ref: (H_in, H_out) pre-transposed weight (bf16)
    # b_ref: (1, H_out)    bias (f32)
    # o_ref: (TB, H_out)
    x = x_ref[...].astype(w_ref.dtype)              # bf16 MXU operands
    y = jnp.dot(x, w_ref[...], preferred_element_type=jnp.float32)
    y = y + b_ref[...].astype(jnp.float32)          # f32 bias add post-acc
    o_ref[...] = jnp.tanh(y).astype(o_ref.dtype)


def _round_up(x: int, m: int) -> int:
    return ((x + m - 1) // m) * m


def bert_pooler_head(features, weight, bias, *, block_b=128,
                     compute_dtype=jnp.bfloat16):
    """tanh(features[:, 0, :] @ weight.T + bias).

    features: [B, S, H_in]; weight: [H_out, H_in] (PyTorch Linear layout);
    bias: [H_out]. Returns [B, H_out] in features.dtype.
    """
    B, S, H_in = features.shape
    H_out, _ = weight.shape

    # One-time wrapper prep (single fused XLA transpose+cast, O(H^2)).
    w_t = weight.T.astype(compute_dtype)              # (H_in, H_out), bf16
    b2 = bias.reshape(1, H_out).astype(jnp.float32)   # f32

    # Batch tile: >=2 grid steps whenever B > 8 (v7x megacore + pipeline
    # overlap), multiple of 8 for sublane alignment, capped at block_b so the
    # cls/out tiles stay small while the MXU M dim stays reasonably full.
    if B <= 8:
        tb = B
    else:
        tb = min(block_b, _round_up(pl.cdiv(B, 2), 8))
    grid = (pl.cdiv(B, tb),)

    out_shape = jax.ShapeDtypeStruct((B, H_out), features.dtype)
    compiler_params = pltpu.CompilerParams(
        dimension_semantics=("parallel",),  # shard batch tiles across TCs (v7x)
    )

    def _call(fused_cls: bool, single_buffer_consts: bool):
        if fused_cls:
            # The kernel's input DMA does the strided [CLS] gather directly
            # from the [B, S, H] tensor; only B*H elements ever leave HBM.
            x = features
            x_spec = pl.BlockSpec((tb, pl.Squeezed(), H_in), lambda i: (i, 0, 0))
        else:
            x = features[:, 0, :]
            x_spec = pl.BlockSpec((tb, H_in), lambda i: (i, 0))

        if single_buffer_consts:
            # Grid-invariant operands: no double buffering -> half the VMEM.
            w_spec = pl.BlockSpec((H_in, H_out), lambda i: (0, 0),
                                  pipeline_mode=pl.Buffered(1))
            b_spec = pl.BlockSpec((1, H_out), lambda i: (0, 0),
                                  pipeline_mode=pl.Buffered(1))
        else:
            w_spec = pl.BlockSpec((H_in, H_out), lambda i: (0, 0))
            b_spec = pl.BlockSpec((1, H_out), lambda i: (0, 0))

        return pl.pallas_call(
            _pooler_kernel,
            out_shape=out_shape,
            grid_spec=pltpu.PrefetchScalarGridSpec(
                num_scalar_prefetch=0,
                grid=grid,
                in_specs=[x_spec, w_spec, b_spec],
                out_specs=pl.BlockSpec((tb, H_out), lambda i: (i, 0)),
            ),
            compiler_params=compiler_params,
        )(x, w_t, b2)

    try:
        return _call(fused_cls=True, single_buffer_consts=True)
    except Exception:
        # This build rejected the squeezed-CLS block or Buffered(1); fall back
        # to a wrapper-side slice + default double-buffering (still bf16 +
        # pre-transposed weight).
        return _call(fused_cls=False, single_buffer_consts=False)


if __name__ == "__main__":
    # Small but layout-representative shapes: lane dim H=128, B=16 -> two
    # batch tiles of 8 (exercises the multi-step grid / parallel batch axis).
    B, S, H = 16, 8, 128
    key = jax.random.PRNGKey(0)
    k_feat, k_w, k_b = jax.random.split(key, 3)

    features = jax.random.normal(k_feat, (B, S, H), dtype=jnp.float32)
    # Deterministic synthetic pooler.dense params (Linear(H, H), PyTorch [out, in]).
    weight = jax.random.normal(k_w, (H, H), dtype=jnp.float32) * 0.02
    bias = jax.random.normal(k_b, (H,), dtype=jnp.float32) * 0.02

    out = jax.block_until_ready(bert_pooler_head(features, weight, bias))

    # Pure-JAX f32 reference; kernel computes the matmul in bf16 (f32 acc),
    # so the tolerance is relaxed accordingly.
    ref = jnp.tanh(features[:, 0, :] @ weight.T + bias)
    assert out.shape == (B, H), out.shape
    assert out.dtype == features.dtype, out.dtype
    assert jnp.allclose(out, ref, atol=1e-2, rtol=1e-2), float(
        jnp.max(jnp.abs(out - ref)))

    print("KERNEL_OK")
</pallas_src>

<mosaic_0001>
module attributes {stable_mosaic.version = 11 : i64} {
  func.func @_pooler_kernel(%arg0: i32, %arg1: memref<8x128xf32, #tpu.memory_space<vmem>>, %arg2: memref<128x128xbf16, #tpu.memory_space<vmem>>, %arg3: memref<1x128xf32, #tpu.memory_space<vmem>>, %arg4: memref<8x128xf32, #tpu.memory_space<vmem>>) attributes {dimension_semantics = [#tpu.dimension_semantics<parallel>], iteration_bounds = array<i64: 2>, scalar_prefetch = 0 : i64, scratch_operands = 0 : i64, tpu.core_type = #tpu.core_type<tc>, window_params = [{transform_indices = @transform_0, window_bounds = array<i64: 8, 128>}, {pipeline_mode = #tpu.pipeline_mode<synchronous>, transform_indices = @transform_1, window_bounds = array<i64: 128, 128>}, {pipeline_mode = #tpu.pipeline_mode<synchronous>, transform_indices = @transform_2, window_bounds = array<i64: 1, 128>}, {transform_indices = @transform_3, window_bounds = array<i64: 8, 128>}]} {
    %c0 = arith.constant 0 : index
    %c0_0 = arith.constant 0 : index
    %0 = vector.load %arg1[%c0, %c0_0] : memref<8x128xf32, #tpu.memory_space<vmem>>, vector<8x128xf32>
    %1 = arith.truncf %0 : vector<8x128xf32> to vector<8x128xbf16>
    %c0_1 = arith.constant 0 : index
    %c0_2 = arith.constant 0 : index
    %2 = vector.load %arg2[%c0_1, %c0_2] : memref<128x128xbf16, #tpu.memory_space<vmem>>, vector<128x128xbf16>
    %cst = arith.constant dense<0.000000e+00> : vector<8x128xf32>
    %3 = tpu.matmul %1, %2, %cst {dimension_numbers = #tpu.dot_dimension_numbers<[1], [0], [0], [1], [0, 0, 1, 1], [], []>} : vector<8x128xbf16>, vector<128x128xbf16>, vector<8x128xf32> -> vector<8x128xf32>
    %c0_3 = arith.constant 0 : index
    %c0_4 = arith.constant 0 : index
    %4 = vector.load %arg3[%c0_3, %c0_4] : memref<1x128xf32, #tpu.memory_space<vmem>>, vector<1x128xf32>
    %5 = vector.broadcast %4 : vector<1x128xf32> to vector<8x128xf32>
    %6 = arith.addf %3, %5 : vector<8x128xf32>
    %7 = math.tanh %6 : vector<8x128xf32>
    %c0_5 = arith.constant 0 : index
    %c0_6 = arith.constant 0 : index
    %8 = vector.load %arg4[%c0_5, %c0_6] : memref<8x128xf32, #tpu.memory_space<vmem>>, vector<8x128xf32>
    tpu.vector_store %arg4[%c0_5, %c0_6], %7 {strides = array<i32>} : memref<8x128xf32, #tpu.memory_space<vmem>>, vector<8x128xf32>,
    return
  }
  func.func @transform_0(%arg0: i32) -> (i32, i32) {
    %c0_i32 = arith.constant 0 : i32
    %c0_i32_0 = arith.constant 0 : i32
    return %arg0, %c0_i32 : i32, i32
  }
  func.func @transform_1(%arg0: i32) -> (i32, i32) {
    %c0_i32 = arith.constant 0 : i32
    %c0_i32_0 = arith.constant 0 : i32
    %c0_i32_1 = arith.constant 0 : i32
    return %c0_i32, %c0_i32_0 : i32, i32
  }
  func.func @transform_2(%arg0: i32) -> (i32, i32) {
    %c0_i32 = arith.constant 0 : i32
    %c0_i32_0 = arith.constant 0 : i32
    %c0_i32_1 = arith.constant 0 : i32
    return %c0_i32, %c0_i32_0 : i32, i32
  }
  func.func @transform_3(%arg0: i32) -> (i32, i32) {
    %c0_i32 = arith.constant 0 : i32
    %c0_i32_0 = arith.constant 0 : i32
    return %arg0, %c0_i32 : i32, i32
  }
}

</mosaic_0001>

<bundles_post_ra>
// kernel: tpu_custom_call.1
= control target key start
LH: loop header
LB: loop body
LE: loop exit
PB: predicated region body
PF: predicated region fallthrough
CT: control target
= control target key end

     0   :  { %8 = vsyncpa [#allocation3], 0  ;;  %s894_s0 = inlined_call_operand.hbm [shape: f32[16,128], index: 0, kind: input, shape index: {}]   ;;  %s895_s1 = inlined_call_operand.hbm [shape: bf16[128,128], index: 1, kind: input, shape index: {}]   ;;  %s896_s2 = inlined_call_operand.vmem [shape: f32[1,128], index: 2, kind: input, shape index: {}]   ;;  %s897_s3 = inlined_call_operand.hbm [shape: f32[16,128], index: 3, kind: output, shape index: {}]  }
   0x1   :  { %10 = vsyncpa [#allocation3 + $0x1], 0 }
   0x2   :  { %11 = vsyncpa [#allocation6], 0 }
   0x3   :  { %12 = vsyncpa [#allocation4], 0 }
   0x4   :  { %14 = vsyncpa [#allocation4 + $0x1], 0  ;;  %s691_s12 = smov 0   ;;  %s693_s13 = smov 0  }
   0x5   :  { %s695_s14 = smov 0   ;;  %s697_s15 = smov 0  }
   0x6 LB: > { %s712_s16 = sadd.s32 4294967295, %s662_s15   ;;  %s411_s17 = sadd.s32 4294967294, %s662_s15   ;;  %s662_s15 = sphi %s697_s15, %s917_s15   ;;  %s658_s14 = sphi %s695_s14, %s916_s14   ;;  %s654_s13 = sphi %s693_s13, %s915_s13   ;;  %s650_s12 = sphi %s691_s12, %s914_s12  }
   0x7   : > { %p40_p0 = scmp.ne.s32.totalorder %s654_s13, %s650_s12  ;;  %p898_p1 = scmp.eq.s32.totalorder %s712_s16, 0 }
   0x8   : > { %p112_p3 = scmp.eq.s32.totalorder %s411_s17, 1  ;;  %p412_p5 = scmp.ge.s32.totalorder %s662_s15, 1 }
   0x9   : > { %p721_p4 = por %p898_p1, %p40_p0  ;;  %p119_p7 = scmp.lt.s32.totalorder %s662_s15, 3 }
   0xa   : > { %p726_p6 = por %p112_p3, %p40_p0  ;;  %s664_s21 = smov [#allocation5]  }
   0xb   : > { %s901_s18 = scalar_select %p721_p4, 1, 0 }
   0xc   : > { %s902_s19 = scalar_select %p726_p6, 1, 0 }
   0xd   : > { %p731_p8 = pnand %p412_p5, %p119_p7  ;;  %s131_s22 = sshll.u32 %s664_s21, 4  ;;  %s735_s22 = int_to_ptr.vmem [resolvable:$true] %s131_s22 }
   0xe   : > { %s747_s24 = sadd.s32 1, %s662_s15   ;;  %s27_s25 = sadd.s32 1, %s658_s14 }
   0xf   : > { %s903_s20 = scalar_select %p731_p8, 1, 0 }
  0x10   : > { %p471_p9 = pneg %p731_p8  ;;  %s24_s26 = ssub.s32 %s662_s15, %s747_s24 }
  0x11   : > { %s534_s29 = scalar_lea.hbm %s895_s1, 1024 }
  0x12   : > { %p742_p11 = pnand %p471_p9, %p898_p1  ;;  %p535_p12 = scmp.ne.s32.totalorder %s895_s1, %s534_s29 }
  0x13   : > { %p541_p5 = scmp.lt.u32.totalorder %s534_s29, %s895_s1 }
  0x14   : > { %p536_p13 = pneg %p742_p11 }
  0x16   : > { %p537_p0 = pnand %p536_p13, %p535_p12 }
  0x18   : > { %p538_p3 = pneg %p537_p0 }
  0x1a   : > { %p543_p7 = pnand %p541_p5, %p538_p3 }
  0x1c   : > { %546 = shalt.err (!%p543_p7)
}
  0x1d   : > { %s547_s7 = scalar_lea.vmem %s735_s22, 1024  ;;  %p555_p2 = scmp.lt.s32.totalorder %s735_s22, %s735_s22 }
  0x1e   : > { %p548_p9 = scmp.ne.s32.totalorder %s735_s22, %s547_s7  ;;  %p556_p6 = scmp.lt.s32.totalorder %s547_s7, %s547_s7 }
  0x20   : > { %p550_p10 = pnand %p548_p9, %p536_p13  ;;  %p557_p4 = por %p556_p6, %p555_p2 }
  0x22   : > { %p551_p1 = pneg %p550_p10 }
  0x24   : > { %p558_p8 = pnand %p557_p4, %p551_p1 }
  0x26   : > { %561 = shalt.err (!%p558_p8)
}
  0x27   : > { %s665_s8 = smov 64   ;;  %s666_s9 = smov 4  }
  0x28   : > { %474 = dma.hbm_to_vmem [thread:$0]  (!%p742_p11), %s895_s1, 1024, %s735_s22, [#allocation6], %s665_s8, %s665_s8, %s666_s9  }
  0x29   : > { %p25_p2 = scmp.eq.s32.totalorder %s24_s26, 0  ;;  %p34_p1 = scmp.ne.s32.totalorder %s658_s14, %s654_s13 }
  0x2a   : > { %p35_p4 = scmp.eq.s32.totalorder %s662_s15, 0  ;;  %p484_p6 = scmp.lt.s32.totalorder %s662_s15, 2 }
  0x2b   : > { %s778_s17 = scalar_select %p25_p2, %s658_s14, %s27_s25  }
  0x2c   : > { %p36_p8 = por %p35_p4, %p34_p1  ;;  %p905_p10 = scmp.eq.s32.totalorder %s712_s16, 1 }
  0x2d   : > { %s148_s27 = sand.u32 1, %s658_s14   ;;  %s416_s28 = sshll.u32 %s662_s15, 7 }
  0x2e   : > { %p782_p12 = por %p905_p10, %p34_p1  ;;  %s415_s29 = sshll.u32 %s148_s27, 3 }
  0x2f   : > { %s791_s4 = scalar_lea.hbm %s894_s0, %s416_s28  ;;  %s152_s22 = scalar_lea.vmem [#allocation2], %s415_s29 }
  0x30   : > { %s159_s25 = sshll.u32 %s152_s22, 4  ;;  %p793_p11 = pnand %p484_p6, %p36_p8  ;;  %s797_s25 = int_to_ptr.vmem [resolvable:$true] %s159_s25 }
  0x31   : > { %s149_s5 = scalar_lea.sflag [#allocation3], %s148_s27  ;;  %s562_s6 = scalar_lea.hbm %s791_s4, 128 }
  0x32   : > { %p563_p13 = scmp.ne.s32.totalorder %s791_s4, %s562_s6  ;;  %p564_p0 = pneg %p793_p11 }
  0x33   : > { %s567_s9 = scalar_lea.hbm %s894_s0, 256  ;;  %p568_p7 = scmp.lt.u32.totalorder %s791_s4, %s894_s0 }
  0x34   : > { %p565_p3 = pnand %p564_p0, %p563_p13  ;;  %p569_p9 = scmp.lt.u32.totalorder %s567_s9, %s562_s6 }
  0x35   : > { %p571_p1 = scmp.lt.u32.totalorder %s562_s6, %s791_s4 }
  0x36   : > { %p566_p5 = pneg %p565_p3  ;;  %p570_p2 = por %p569_p9, %p568_p7 }
  0x38   : > { %p572_p4 = por %p571_p1, %p570_p2 }
  0x3a   : > { %p573_p6 = pnand %p572_p4, %p566_p5 }
  0x3c   : > { %576 = shalt.err (!%p573_p6)
}
  0x3d   : > { %s577_s27 = scalar_lea.vmem %s797_s25, 128  ;;  %s667_s28 = smov [#allocation2]  }
  0x3e   : > { %p578_p8 = scmp.ne.s32.totalorder %s797_s25, %s577_s27  ;;  %s582_s29 = sshll.u32 %s667_s28, 4  ;;  %s583_s29 = int_to_ptr.vmem [resolvable:$false] %s582_s29 }
  0x3f   : > { %s584_s23 = scalar_lea.vmem %s583_s29, 256  ;;  %p585_p3 = scmp.lt.s32.totalorder %s797_s25, %s583_s29 }
  0x40   : > { %p580_p10 = pnand %p578_p8, %p564_p0  ;;  %p586_p7 = scmp.lt.s32.totalorder %s584_s23, %s577_s27 }
  0x42   : > { %p581_p13 = pneg %p580_p10  ;;  %p587_p9 = por %p586_p7, %p585_p3 }
  0x44   : > { %p588_p2 = pnand %p587_p9, %p581_p13 }
  0x46   : > { %591 = shalt.err (!%p588_p2)
}
  0x47   : > { %478 = dma.hbm_to_vmem [thread:$0]  (!%p793_p11), %s791_s4, 128, %s797_s25, %s149_s5  }
  0x48   : > { %p908_p5 = scmp.ne.s32.totalorder %s903_s20, 0 }
  0x49   : > { %s827_s30 = sand.u32 (!%p908_p5), 1, %s654_s13   ;;  %p909_p0 = scmp.ne.s32.totalorder (!%p908_p5), %s901_s18, 0 }
  0x4a   : > { %168 = sbr.rel (%p908_p5) target bundleno = 357 (0x165), region = 32  ;;  %s418_s22 = sshll.u32 (!%p908_p5), %s827_s30, 3 }
  0x4b   : > { %s171_s6 = scalar_lea.sflag (!%p908_p5), [#allocation3], %s827_s30  ;;  %s174_s7 = scalar_lea.vmem (!%p908_p5), [#allocation2], %s418_s22 }
  0x51   : > { %637 = dma.done.wait (%p909_p0), %s171_s6, 128  }
  0x52   : > { %639 = vsyncadd (%p909_p0), %s171_s6, 4294967168  ;;  %p910_p11 = scmp.eq.s32.totalorder %s712_s16, 0 }
  0x54   : > { %641 = dma.done.wait (%p910_p11), [#allocation6], 1024   ;;  %p911_p1 = pmov %p910_p11 }
  0x55   : > { %v668_v0 = vmov 0.0   ;;  %vm669_vm0 = vmmov 0   ;;  %v524_v1 = vld [vmem:[#allocation5] sm:$0xff]   ;;  %v525_v2 = vld [vmem:[#allocation5 + $0x8] sm:$0xff]   ;;  %v526_v3 = vld [vmem:[#allocation5 + $0x10] sm:$0xff]   ;;  %s431_s4 = sshll.u32 %s712_s16, 7 }
  0x56   : > { %643 = vsyncadd (%p911_p1), [#allocation6], 4294966272  ;;  %443 = vmatprep.subr.bf16.mxu0 %v668_v0  ;;  %459 = vmatprep.mubr.msk.bf16.mxu0 %vm669_vm0, %v668_v0  ;;  %v527_v4 = vld [vmem:[#allocation5 + $0x18] sm:$0xff]   ;;  %v528_v5 = vld [vmem:[#allocation5 + $0x20] sm:$0xff]   ;;  %s200_s25 = scalar_lea.vmem [#allocation7], %s418_s22  ;;  %s850_s9 = scalar_lea.hbm %s897_s3, %s431_s4 }
  0x57   : > { %444 = vmatpush3.bf16.msra.mxu0 %v524_v1  ;;  %v529_v6 = vld [vmem:[#allocation5 + $0x28] sm:$0xff]   ;;  %v530_v7 = vld [vmem:[#allocation5 + $0x30] sm:$0xff]   ;;  %v531_v8 = vld [vmem:[#allocation5 + $0x38] sm:$0xff]   ;;  %s331_s26 = sshll.u32 %s200_s25, 4  ;;  %s318_s10 = scalar_lea.sflag [#allocation4], %s827_s30  ;;  %s852_s26 = int_to_ptr.vmem [resolvable:$true] %s331_s26 }
  0x58   : > { %445 = vmatprep.subr.bf16.mxu0 %v668_v0  ;;  %v202_v9 = vld [vmem:[%s174_s7] sm:$0xff]  ;;  %s592_s11 = scalar_lea.vmem %s852_s26, 128  ;;  %s670_s16 = smov [#allocation7]  }
  0x59   : > { %v203_v10 = vpack.c.bf16 %v202_v9, %v202_v9  ;;  %v421_v11 = vld [vmem:[%s896_s2] ss:$0 sm:$0xff]  ;;  %p593_p4 = scmp.ne.s32.totalorder %s852_s26, %s592_s11  ;;  %s596_s27 = sshll.u32 %s670_s16, 4  ;;  %s597_s27 = int_to_ptr.vmem [resolvable:$false] %s596_s27 }
  0x5a   : > { %s598_s28 = scalar_lea.vmem %s597_s27, 256  ;;  %p599_p10 = scmp.lt.s32.totalorder %s852_s26, %s597_s27 }
  0x5b   : > { %446 = vmatpush3.bf16.msra.mxu0 %v525_v2  ;;  %p594_p6 = pnand %p593_p4, %p782_p12  ;;  %p600_p13 = scmp.lt.s32.totalorder %s598_s28, %s592_s11 }
  0x5c   : > { %447 = vmatprep.subr.bf16.mxu0 %v668_v0 }
  0x5d   : > { %p595_p8 = pneg %p594_p6  ;;  %p601_p3 = por %p600_p13, %p599_p10 }
  0x5f   : > { %448 = vmatpush3.bf16.msra.mxu0 %v526_v3  ;;  %p602_p7 = pnand %p601_p3, %p595_p8 }
  0x60   : > { %449 = vmatprep.subr.bf16.mxu0 %v668_v0 }
  0x63   : > { %450 = vmatpush3.bf16.msra.mxu0 %v527_v4 }
  0x64   : > { %451 = vmatprep.subr.bf16.mxu0 %v668_v0 }
  0x67   : > { %452 = vmatpush3.bf16.msra.mxu0 %v528_v5 }
  0x68   : > { %453 = vmatprep.subr.bf16.mxu0 %v668_v0 }
  0x6b   : > { %454 = vmatpush3.bf16.msra.mxu0 %v529_v6 }
  0x6c   : > { %455 = vmatprep.subr.bf16.mxu0 %v668_v0 }
  0x6f   : > { %456 = vmatpush3.bf16.msra.mxu0 %v530_v7 }
  0x70   : > { %457 = vmatprep.subr.bf16.mxu0 %v668_v0 }
  0x73   : > { %458 = vmatpush3.bf16.msra.mxu0 %v531_v8 }
  0x76   : > { %460 = vmatmul.mubr.bf16.vlgmr.msra.gmra.mrb[0].mxu0 %v203_v10 }
 0x149   : > { %v309_v12 = vpop.f32.mrb[0].mxu0 }
 0x14a   : > { %v310_v13 = vadd.f32 %v421_v11, %v309_v12  ;;  %v461_v14 = vpop.f32.mrb[1].mxu0 }
 0x14b   : > { %v312_v15 = vpop.f32.mrb[2].mxu0 }
 0x14c   : > { %532 = vtanh.f32 %v310_v13  ;;  %v462_v16 = vpop.f32.mrb[3].mxu0 }
 0x156   : > { %v533_v17 = vpop.eup %532 }
 0x157   : > { %316 = vst [vmem:[%s200_s25] sm:$0xff] %v533_v17 }
 0x158   : > { %605 = shalt.err (!%p602_p7)
}
 0x159   : > { %s606_s29 = scalar_lea.hbm %s850_s9, 128  ;;  %s610_s22 = scalar_lea.hbm %s897_s3, 256 }
 0x15a   : > { %p607_p9 = scmp.ne.s32.totalorder %s850_s9, %s606_s29  ;;  %p611_p0 = scmp.lt.u32.totalorder %s850_s9, %s897_s3 }
 0x15b   : > { %p612_p11 = scmp.lt.u32.totalorder %s610_s22, %s606_s29  ;;  %p614_p4 = scmp.lt.u32.totalorder %s606_s29, %s850_s9 }
 0x15c   : > { %p608_p2 = pnand %p607_p9, %p782_p12 }
 0x15d   : > { %p613_p1 = por %p612_p11, %p611_p0 }
 0x15e   : > { %p609_p5 = pneg %p608_p2 }
 0x15f   : > { %p615_p6 = por %p614_p4, %p613_p1 }
 0x161   : > { %p616_p8 = pnand %p615_p6, %p609_p5 }
 0x163   : > { %619 = shalt.err (!%p616_p8)
}
 0x164   : > { %469 = dma.vmem_to_hbm [thread:$0]  (%p782_p12), %s852_s26, 128, %s850_s9, %s318_s10  }
 0x165 PF: > { %s343_s18 = sand.u32 1, %s650_s12   ;;  %p912_p10 = scmp.ne.s32.totalorder %s902_s19, 0 }
 0x166   : > { %p913_p13 = scmp.ge.s32.totalorder %s662_s15, 2  ;;  %s344_s20 = scalar_lea.sflag [#allocation4], %s343_s18 }
 0x168   : > { %p480_p3 = pnand %p913_p13, %p912_p10 }
 0x16a   : > { %645 = dma.done.wait (!%p480_p3), %s344_s20, 128  }
 0x16b   : > { %647 = vsyncadd (!%p480_p3), %s344_s20, 4294967168  ;;  %p17_p7 = scmp.ge.s32.totalorder %s747_s24, 4   ;;  %s914_s12 = smov %s654_s13 }
 0x16c   : > { %s915_s13 = smov %s658_s14  ;;  %s916_s14 = smov %s778_s17 }
 0x16d   : > { %s917_s15 = smov %s747_s24  ;;  %19 = sbr.rel (!%p17_p7) target bundleno = 6 (0x6), region = 81 }
 0x174   :  { %349 = vsyncpa [#allocation3], 1 }
 0x175   :  { %351 = vsyncpa [#allocation3 + $0x1], 1 }
 0x176   :  { %352 = vsyncpa [#allocation6], 1 }
 0x177   :  { %353 = vsyncpa [#allocation4], 1 }
 0x178   :  { %355 = vsyncpa [#allocation4 + $0x1], 1 }

</bundles_post_ra>
